<compile_context>
chip_gen: v5e
topology: v5e:2x2
jax: 0.10.0
libtpu: 0.0.40
codegen_flags: <defaults>
</compile_context>

<pallas_src>
import functools
import math

import jax
import jax.numpy as jnp
from jax.experimental import pallas as pl
from jax.experimental.pallas import tpu as pltpu


# ---------------------------------------------------------------------------
# Fused TemporalBlock Pallas kernel
# ---------------------------------------------------------------------------

def _temporal_block_kernel(*refs, K, dilation, TL, pad, L, has_downsample,
                           mxu_dtype, mode1, mode2):
    """One (batch, time-tile) step of a fused TemporalBlock.

    Refs (in order):
      x_ref   : (1, Cin, TL)                    current input time tile
      w1_ref  : (Cout, K*Cin) or (K, Cout, Cin) conv1 weight (layout per mode1)
      b1_ref  : (Cout, 1)
      w2_ref  : (Cout, K*Cout) or (K, Cout, Cout) conv2 weight (layout per mode2)
      b2_ref  : (Cout, 1)
      [wd_ref : (Cout, Cin), bd_ref : (Cout, 1)]  1x1 downsample (only if Cin != Cout)
      o_ref   : (1, Cout, TL)                   output tile
      xh, oh  : VMEM scratch (Cin, pad) / (Cout, pad) causal history (mxu dtype)
    """
    if has_downsample:
        (x_ref, w1_ref, b1_ref, w2_ref, b2_ref, wd_ref, bd_ref, o_ref, xh, oh) = refs
    else:
        (x_ref, w1_ref, b1_ref, w2_ref, b2_ref, o_ref, xh, oh) = refs
        wd_ref = bd_ref = None

    t = pl.program_id(1)

    if pad > 0:
        # New batch element: history = zeros (== causal left zero-padding / Chomp1d).
        @pl.when(t == 0)
        def _():
            xh[...] = jnp.zeros_like(xh)
            oh[...] = jnp.zeros_like(oh)

    x_cur = x_ref[0]                                            # (Cin, TL), input dtype
    if (L % TL) != 0:
        # Ragged last tile: zero out-of-range columns (they came from a partial DMA).
        col = jax.lax.broadcasted_iota(jnp.int32, (1, TL), 1)
        valid = (t * TL + col) < L
        x_cur = jnp.where(valid, x_cur, jnp.zeros_like(x_cur))
    x_m = x_cur.astype(mxu_dtype)                               # single cast, pre-slicing

    def causal_conv(full_m, w_ref, b_ref, mode):
        """Dilated causal conv over `full_m` (C_in, pad+TL) -> (C_out, TL) f32."""
        if mode == "concat":
            # Taps concatenated on the contraction (sublane) axis -> one MXU matmul.
            if K > 1:
                op = jnp.concatenate(
                    [full_m[:, k * dilation:k * dilation + TL] for k in range(K)], axis=0)
            else:
                op = full_m
            acc = jnp.dot(w_ref[...], op, preferred_element_type=jnp.float32)
        else:
            # K accumulated matmuls: no (K*C, TL) staging buffer.
            acc = None
            for k in range(K):
                part = jnp.dot(w_ref[k], full_m[:, k * dilation:k * dilation + TL],
                               preferred_element_type=jnp.float32)
                acc = part if acc is None else acc + part
        return acc + b_ref[...]

    # ---- conv1 + chomp1 + relu1 (+ dropout1 = identity in eval) -------------
    x_full = jnp.concatenate([xh[...], x_m], axis=1) if pad > 0 else x_m
    h1 = jnp.maximum(causal_conv(x_full, w1_ref, b1_ref, mode1), 0.0)   # (Cout, TL) f32
    h1_m = h1.astype(mxu_dtype)                                 # single cast, pre-slicing

    # ---- conv2 + chomp2 + relu2 (+ dropout2 = identity in eval) -------------
    o_full = jnp.concatenate([oh[...], h1_m], axis=1) if pad > 0 else h1_m
    h2 = jnp.maximum(causal_conv(o_full, w2_ref, b2_ref, mode2), 0.0)   # (Cout, TL) f32

    # ---- residual branch + final relu ---------------------------------------
    if has_downsample:
        res = jnp.dot(wd_ref[...], x_m, preferred_element_type=jnp.float32) + bd_ref[...]
    else:
        res = x_cur.astype(jnp.float32)                         # identity (Cin == Cout)
    o_ref[0] = jnp.maximum(h2 + res, 0.0).astype(o_ref.dtype)

    # ---- carry causal history into the next time tile -----------------------
    if pad > 0:
        xh[...] = x_full[:, TL:]                                # last `pad` columns
        oh[...] = o_full[:, TL:]


# ---------------------------------------------------------------------------
# Tile-size / VMEM budgeting helpers
# ---------------------------------------------------------------------------

def _round_up(v, m):
    return -(-v // m) * m


def _estimate_vmem_bytes(TL, Cin, Cout, K, pad, x_b, o_b, m_b, has_down):
    tiles = 2 * TL * (Cin * x_b + Cout * o_b)                   # double-buffered in/out tiles
    wts = 2 * m_b * (K * Cout * Cin + K * Cout * Cout + (Cout * Cin if has_down else 0))
    wts += 4 * 4 * Cout                                         # biases (f32), double-buffered
    hist = m_b * (Cin + Cout) * max(pad, 1)                     # history scratch
    tmps = m_b * TL * K * (Cin + Cout) + 4 * TL * (3 * Cout + Cin)   # operands + f32 temps
    return tiles + wts + hist + tmps


def _pick_time_tile(L, Cin, Cout, K, pad, x_b, o_b, m_b, has_down, budget):
    cap = _round_up(max(L, 1), 128)                             # never bigger than needed
    for cand in (1024, 512, 256, 128):
        tl = min(cand, cap)
        if _estimate_vmem_bytes(tl, Cin, Cout, K, pad, x_b, o_b, m_b, has_down) <= budget:
            return tl
    return 128


# ---------------------------------------------------------------------------
# JAX wrapper
# ---------------------------------------------------------------------------

def temporal_block_forward(x, params, *, kernel_size, dilation, stride=1, padding=None,
                           dropout=0.2, time_tile=None, mxu_dtype=jnp.bfloat16,
                           out_dtype=None, accum_threshold=256,
                           vmem_budget_bytes=40 * 1024 * 1024,
                           vmem_limit_bytes=60 * 1024 * 1024):
    """Fused TemporalBlock forward.  x: (B, Cin, L) in PyTorch NCL layout -> (B, Cout, L).

    bf16 activations in HBM are supported by simply passing a bf16 `x` (and/or
    `out_dtype=jnp.bfloat16`) — halves HBM traffic of this memory-bound kernel.
    """
    del dropout  # TODO(synk): training-mode dropout (p=0.2) not implemented; eval semantics.
    assert stride == 1, "TCN TemporalBlock uses stride=1"  # TODO(synk): strided conv unsupported.
    K = kernel_size
    pad = (K - 1) * dilation
    if padding is not None:
        assert padding == pad, "causal TCN requires padding == (kernel_size-1)*dilation"
    if mxu_dtype is None:
        mxu_dtype = jnp.float32
    m_bytes = jnp.dtype(mxu_dtype).itemsize

    B, Cin, L = x.shape
    w1, b1, w2, b2 = params["w1"], params["b1"], params["w2"], params["b2"]
    Cout = w1.shape[0]
    has_down = params.get("wd") is not None
    if not has_down:
        assert Cin == Cout, "identity residual requires n_inputs == n_outputs"

    out_dt = jnp.dtype(out_dtype) if out_dtype is not None else x.dtype
    x_bytes = jnp.dtype(x.dtype).itemsize
    o_bytes = jnp.dtype(out_dt).itemsize

    # --- time tiling: lane-dense (multiple of 128), sized against a VMEM budget ---
    if time_tile is None:
        TL = _pick_time_tile(L, Cin, Cout, K, pad, x_bytes, o_bytes, m_bytes,
                             has_down, vmem_budget_bytes)
    else:
        assert time_tile % 128 == 0
        TL = time_tile
    NT = pl.cdiv(L, TL)    # ragged last tile handled in-kernel (no jnp.pad HBM pass)

    # --- per-conv matmul formulation ---
    # small C: single matmul with K*C contraction; large C: K accumulated matmuls
    # (crossover ~256 on v6e/v7x 256x256 MXU; ~128 on v5e).
    mode1 = "accum" if Cin >= accum_threshold else "concat"
    mode2 = "accum" if Cout >= accum_threshold else "concat"

    def prep_w(w, mode):
        Co, Ci, Kk = w.shape
        if mode == "concat":
            # w_flat[o, k*Ci + i] = w[o, i, k]
            return jnp.transpose(w, (0, 2, 1)).reshape(Co, Kk * Ci).astype(mxu_dtype)
        return jnp.transpose(w, (2, 0, 1)).astype(mxu_dtype)    # (K, Cout, Cin)

    w1_a = prep_w(w1, mode1)
    w2_a = prep_w(w2, mode2)
    b1c = b1.reshape(Cout, 1).astype(jnp.float32)
    b2c = b2.reshape(Cout, 1).astype(jnp.float32)

    def const_spec(shape):
        nd = len(shape)
        return pl.BlockSpec(shape, lambda b, t, _nd=nd: (0,) * _nd)

    in_specs = [
        pl.BlockSpec((1, Cin, TL), lambda b, t: (b, 0, t)),
        const_spec(w1_a.shape), const_spec(b1c.shape),
        const_spec(w2_a.shape), const_spec(b2c.shape),
    ]
    args = [x, w1_a, b1c, w2_a, b2c]
    wd2 = None
    if has_down:
        wd2 = params["wd"][:, :, 0].astype(mxu_dtype)           # (Cout, Cin)
        bdc = params["bd"].reshape(Cout, 1).astype(jnp.float32)
        in_specs += [const_spec(wd2.shape), const_spec(bdc.shape)]
        args += [wd2, bdc]

    kernel = functools.partial(
        _temporal_block_kernel, K=K, dilation=dilation, TL=TL, pad=pad, L=L,
        has_downsample=has_down, mxu_dtype=mxu_dtype, mode1=mode1, mode2=mode2)

    # Advisory cost estimate for XLA's scheduler.
    flops = 2 * B * L * K * Cout * (Cin + Cout)
    if has_down:
        flops += 2 * B * L * Cout * Cin
    w_bytes_total = (w1_a.size + w2_a.size + (wd2.size if has_down else 0)) * m_bytes
    bytes_accessed = B * L * (Cin * x_bytes + Cout * o_bytes) + w_bytes_total

    out = pl.pallas_call(
        kernel,
        out_shape=jax.ShapeDtypeStruct((B, Cout, L), out_dt),
        grid=(B, NT),
        in_specs=in_specs,
        out_specs=pl.BlockSpec((1, Cout, TL), lambda b, t: (b, 0, t)),
        scratch_shapes=[
            pltpu.VMEM((Cin, max(pad, 1)), mxu_dtype),    # x history carry
            pltpu.VMEM((Cout, max(pad, 1)), mxu_dtype),   # conv1-output history carry
        ],
        # Batch is independent (megacore-parallel); time carries state -> arbitrary.
        compiler_params=pltpu.CompilerParams(
            dimension_semantics=("parallel", "arbitrary"),
            vmem_limit_bytes=int(vmem_limit_bytes)),
        cost_estimate=pl.CostEstimate(flops=int(flops), transcendentals=0,
                                      bytes_accessed=int(bytes_accessed)),
    )(*args)
    # TODO(synk): when B < num TensorCores (v7x), time could also be split per-core with
    # a pad-wide history recompute at segment starts; not implemented.
    return out


# ---------------------------------------------------------------------------
# Parameter init (mirrors the PyTorch module's shapes) + pure-JAX reference
# ---------------------------------------------------------------------------

def init_temporal_block(key, n_inputs, n_outputs, kernel_size):
    """Effective weights ~ N(0, 0.01) (init_weights), biases ~ PyTorch Conv1d default.

    weight_norm is folded into the effective weight (synthetic deterministic init).
    """
    k1, k2, k3, k4, k5, k6 = jax.random.split(key, 6)
    w1 = 0.01 * jax.random.normal(k1, (n_outputs, n_inputs, kernel_size), jnp.float32)
    w2 = 0.01 * jax.random.normal(k2, (n_outputs, n_outputs, kernel_size), jnp.float32)
    bnd1 = 1.0 / math.sqrt(n_inputs * kernel_size)
    bnd2 = 1.0 / math.sqrt(n_outputs * kernel_size)
    b1 = jax.random.uniform(k3, (n_outputs,), jnp.float32, -bnd1, bnd1)
    b2 = jax.random.uniform(k4, (n_outputs,), jnp.float32, -bnd2, bnd2)
    params = {"w1": w1, "b1": b1, "w2": w2, "b2": b2, "wd": None, "bd": None}
    if n_inputs != n_outputs:
        bndd = 1.0 / math.sqrt(n_inputs)
        params["wd"] = 0.01 * jax.random.normal(k5, (n_outputs, n_inputs, 1), jnp.float32)
        params["bd"] = jax.random.uniform(k6, (n_outputs,), jnp.float32, -bndd, bndd)
    return params


def temporal_block_ref(x, params, *, kernel_size, dilation):
    """Plain-JAX reference of TemporalBlock.forward (eval mode)."""
    x = x.astype(jnp.float32)

    def causal_conv(h, w, b, dil):
        Co, Ci, Kk = w.shape
        p = (Kk - 1) * dil
        hp = jnp.pad(h, ((0, 0), (0, 0), (p, 0)))
        out = jnp.zeros((h.shape[0], Co, h.shape[2]), jnp.float32)
        for k in range(Kk):
            out = out + jnp.einsum("oc,bcl->bol", w[:, :, k],
                                   hp[:, :, k * dil:k * dil + h.shape[2]])
        return out + b[None, :, None]

    h1 = jax.nn.relu(causal_conv(x, params["w1"], params["b1"], dilation))
    h2 = jax.nn.relu(causal_conv(h1, params["w2"], params["b2"], dilation))
    if params.get("wd") is not None:
        res = jnp.einsum("oc,bcl->bol", params["wd"][:, :, 0], x) + params["bd"][None, :, None]
    else:
        res = x
    return jax.nn.relu(h2 + res)


# ---------------------------------------------------------------------------

if __name__ == "__main__":
    key = jax.random.PRNGKey(0)

    # Case 1: Cin != Cout (1x1 downsample residual), single (ragged) time tile.
    B, Cin, Cout, K, dil, L = 2, 4, 8, 3, 2, 16
    key, kp, kx = jax.random.split(key, 3)
    params = init_temporal_block(kp, Cin, Cout, K)
    x = jax.random.normal(kx, (B, Cin, L), dtype=jnp.float32)

    ref = temporal_block_ref(x, params, kernel_size=K, dilation=dil)
    out_f32 = temporal_block_forward(x, params, kernel_size=K, dilation=dil,
                                     padding=(K - 1) * dil, mxu_dtype=jnp.float32)
    out_bf16 = temporal_block_forward(x, params, kernel_size=K, dilation=dil,
                                      padding=(K - 1) * dil)      # bf16 MXU path
    out_f32, out_bf16 = jax.block_until_ready((out_f32, out_bf16))
    assert out_f32.shape == (B, Cout, L), out_f32.shape
    assert bool(jnp.allclose(out_f32, ref, rtol=2e-2, atol=2e-2))
    assert bool(jnp.allclose(out_bf16, ref, rtol=3e-2, atol=3e-2))

    # Case 2: Cin == Cout (identity residual). Force a 128-lane tile to exercise the
    # cross-tile causal history carry plus a ragged last tile, and also run the
    # auto-tiled path.
    B2, C2, K2, d2, L2 = 2, 8, 3, 4, 200
    key, kp2, kx2 = jax.random.split(key, 3)
    params2 = init_temporal_block(kp2, C2, C2, K2)
    x2 = jax.random.normal(kx2, (B2, C2, L2), dtype=jnp.float32)
    ref2 = temporal_block_ref(x2, params2, kernel_size=K2, dilation=d2)

    out2_multi = temporal_block_forward(x2, params2, kernel_size=K2, dilation=d2,
                                        time_tile=128)            # 2 time tiles
    out2_auto = temporal_block_forward(x2, params2, kernel_size=K2, dilation=d2)
    out2_multi, out2_auto = jax.block_until_ready((out2_multi, out2_auto))
    assert out2_multi.shape == (B2, C2, L2), out2_multi.shape
    assert bool(jnp.allclose(out2_multi, ref2, rtol=3e-2, atol=3e-2))
    assert bool(jnp.allclose(out2_auto, ref2, rtol=3e-2, atol=3e-2))

    # Case 3: accumulate-over-taps conv formulation (large-channel path, forced here
    # with a tiny threshold just to exercise the code path).
    out3 = temporal_block_forward(x2, params2, kernel_size=K2, dilation=d2,
                                  accum_threshold=1)
    out3 = jax.block_until_ready(out3)
    assert bool(jnp.allclose(out3, ref2, rtol=3e-2, atol=3e-2))

    print("KERNEL_OK")
</pallas_src>

<mosaic_0001>
module attributes {stable_mosaic.version = 11 : i64} {
  func.func @_temporal_block_kernel(%arg0: i32, %arg1: i32, %arg2: memref<1x4x128xf32, #tpu.memory_space<vmem>>, %arg3: memref<8x12xf32, #tpu.memory_space<vmem>>, %arg4: memref<8x1xf32, #tpu.memory_space<vmem>>, %arg5: memref<8x24xf32, #tpu.memory_space<vmem>>, %arg6: memref<8x1xf32, #tpu.memory_space<vmem>>, %arg7: memref<8x4xf32, #tpu.memory_space<vmem>>, %arg8: memref<8x1xf32, #tpu.memory_space<vmem>>, %arg9: memref<1x8x128xf32, #tpu.memory_space<vmem>>, %arg10: memref<4x4xf32, #tpu.memory_space<vmem>>, %arg11: memref<8x4xf32, #tpu.memory_space<vmem>>) attributes {dimension_semantics = [#tpu.dimension_semantics<parallel>, #tpu.dimension_semantics<arbitrary>], iteration_bounds = array<i64: 2, 1>, scalar_prefetch = 0 : i64, scratch_operands = 2 : i64, tpu.core_type = #tpu.core_type<tc>, window_params = [{transform_indices = @transform_0, window_bounds = array<i64: 1, 4, 128>}, {pipeline_mode = #tpu.pipeline_mode<synchronous>, transform_indices = @transform_1, window_bounds = array<i64: 8, 12>}, {pipeline_mode = #tpu.pipeline_mode<synchronous>, transform_indices = @transform_2, window_bounds = array<i64: 8, 1>}, {pipeline_mode = #tpu.pipeline_mode<synchronous>, transform_indices = @transform_3, window_bounds = array<i64: 8, 24>}, {pipeline_mode = #tpu.pipeline_mode<synchronous>, transform_indices = @transform_4, window_bounds = array<i64: 8, 1>}, {pipeline_mode = #tpu.pipeline_mode<synchronous>, transform_indices = @transform_5, window_bounds = array<i64: 8, 4>}, {pipeline_mode = #tpu.pipeline_mode<synchronous>, transform_indices = @transform_6, window_bounds = array<i64: 8, 1>}, {transform_indices = @transform_7, window_bounds = array<i64: 1, 8, 128>}]} {
    %c0_i32 = arith.constant 0 : i32
    %0 = arith.cmpi eq, %arg1, %c0_i32 : i32
    %1 = arith.extui %0 : i1 to i32
    %c0_i32_0 = arith.constant 0 : i32
    %2 = arith.cmpi ne, %1, %c0_i32_0 : i32
    scf.if %2 {
      %cst_32 = arith.constant 0.000000e+00 : f32
      %56 = vector.broadcast %cst_32 : f32 to vector<4x4xf32>
      %c0_33 = arith.constant 0 : index
      %c0_34 = arith.constant 0 : index
      %57 = vector.load %arg10[%c0_33, %c0_34] : memref<4x4xf32, #tpu.memory_space<vmem>>, vector<4x4xf32>
      tpu.vector_store %arg10[%c0_33, %c0_34], %56 {strides = array<i32>} : memref<4x4xf32, #tpu.memory_space<vmem>>, vector<4x4xf32>,
      %cst_35 = arith.constant 0.000000e+00 : f32
      %58 = vector.broadcast %cst_35 : f32 to vector<8x4xf32>
      %c0_36 = arith.constant 0 : index
      %c0_37 = arith.constant 0 : index
      %59 = vector.load %arg11[%c0_36, %c0_37] : memref<8x4xf32, #tpu.memory_space<vmem>>, vector<8x4xf32>
      tpu.vector_store %arg11[%c0_36, %c0_37], %58 {strides = array<i32>} : memref<8x4xf32, #tpu.memory_space<vmem>>, vector<8x4xf32>,
    } else {
    }
    %c0 = arith.constant 0 : index
    %c0_1 = arith.constant 0 : index
    %c0_2 = arith.constant 0 : index
    %3 = vector.load %arg2[%c0, %c0_1, %c0_2] : memref<1x4x128xf32, #tpu.memory_space<vmem>>, vector<1x4x128xf32>
    %4 = vector.shape_cast %3 : vector<1x4x128xf32> to vector<4x128xf32>
    %5 = tpu.iota {dimensions = array<i32: 1>} : vector<1x128xi32>
    %c128_i32 = arith.constant 128 : i32
    %6 = arith.muli %arg1, %c128_i32 : i32
    %7 = vector.broadcast %6 : i32 to vector<1x128xi32>
    %8 = arith.addi %7, %5 : vector<1x128xi32>
    %c16_i32 = arith.constant 16 : i32
    %9 = vector.broadcast %c16_i32 : i32 to vector<1x128xi32>
    %10 = arith.cmpi slt, %8, %9 : vector<1x128xi32>
    %cst = arith.constant 0.000000e+00 : f32
    %11 = vector.broadcast %cst : f32 to vector<4x128xf32>
    %12 = vector.shape_cast %10 : vector<1x128xi1> to vector<1x128xi1>
    %13 = vector.broadcast %12 : vector<1x128xi1> to vector<4x128xi1>
    %14 = arith.select %13, %4, %11 : vector<4x128xi1>, vector<4x128xf32>
    %c0_3 = arith.constant 0 : index
    %c0_4 = arith.constant 0 : index
    %15 = vector.load %arg10[%c0_3, %c0_4] : memref<4x4xf32, #tpu.memory_space<vmem>>, vector<4x4xf32>
    %16 = tpu.concatenate %15, %14 in 1 : vector<4x4xf32>, vector<4x128xf32> -> vector<4x132xf32>
    %17 = vector.extract_strided_slice %16 {offsets = [0, 0], sizes = [4, 128], strides = [1, 1]} : vector<4x132xf32> to vector<4x128xf32>
    %18 = vector.extract_strided_slice %16 {offsets = [0, 2], sizes = [4, 128], strides = [1, 1]} : vector<4x132xf32> to vector<4x128xf32>
    %19 = vector.extract_strided_slice %16 {offsets = [0, 4], sizes = [4, 128], strides = [1, 1]} : vector<4x132xf32> to vector<4x128xf32>
    %20 = tpu.concatenate %17, %18, %19 in 0 : vector<4x128xf32>, vector<4x128xf32>, vector<4x128xf32> -> vector<12x128xf32>
    %c0_5 = arith.constant 0 : index
    %c0_6 = arith.constant 0 : index
    %21 = vector.load %arg3[%c0_5, %c0_6] : memref<8x12xf32, #tpu.memory_space<vmem>>, vector<8x12xf32>
    %cst_7 = arith.constant dense<0.000000e+00> : vector<8x128xf32>
    %22 = tpu.matmul %21, %20, %cst_7 {dimension_numbers = #tpu.dot_dimension_numbers<[1], [0], [0], [1], [0, 0, 1, 1], [], []>} : vector<8x12xf32>, vector<12x128xf32>, vector<8x128xf32> -> vector<8x128xf32>
    %c0_8 = arith.constant 0 : index
    %c0_9 = arith.constant 0 : index
    %23 = vector.load %arg4[%c0_8, %c0_9] : memref<8x1xf32, #tpu.memory_space<vmem>>, vector<8x1xf32>
    %24 = vector.broadcast %23 : vector<8x1xf32> to vector<8x128xf32>
    %25 = arith.addf %22, %24 : vector<8x128xf32>
    %cst_10 = arith.constant 0.000000e+00 : f32
    %26 = vector.broadcast %cst_10 : f32 to vector<8x128xf32>
    %27 = arith.maximumf %25, %26 : vector<8x128xf32>
    %c0_11 = arith.constant 0 : index
    %c0_12 = arith.constant 0 : index
    %28 = vector.load %arg11[%c0_11, %c0_12] : memref<8x4xf32, #tpu.memory_space<vmem>>, vector<8x4xf32>
    %29 = tpu.concatenate %28, %27 in 1 : vector<8x4xf32>, vector<8x128xf32> -> vector<8x132xf32>
    %30 = vector.extract_strided_slice %29 {offsets = [0, 0], sizes = [8, 128], strides = [1, 1]} : vector<8x132xf32> to vector<8x128xf32>
    %31 = vector.extract_strided_slice %29 {offsets = [0, 2], sizes = [8, 128], strides = [1, 1]} : vector<8x132xf32> to vector<8x128xf32>
    %32 = vector.extract_strided_slice %29 {offsets = [0, 4], sizes = [8, 128], strides = [1, 1]} : vector<8x132xf32> to vector<8x128xf32>
    %33 = tpu.concatenate %30, %31, %32 in 0 : vector<8x128xf32>, vector<8x128xf32>, vector<8x128xf32> -> vector<24x128xf32>
    %c0_13 = arith.constant 0 : index
    %c0_14 = arith.constant 0 : index
    %34 = vector.load %arg5[%c0_13, %c0_14] : memref<8x24xf32, #tpu.memory_space<vmem>>, vector<8x24xf32>
    %cst_15 = arith.constant dense<0.000000e+00> : vector<8x128xf32>
    %35 = tpu.matmul %34, %33, %cst_15 {dimension_numbers = #tpu.dot_dimension_numbers<[1], [0], [0], [1], [0, 0, 1, 1], [], []>} : vector<8x24xf32>, vector<24x128xf32>, vector<8x128xf32> -> vector<8x128xf32>
    %c0_16 = arith.constant 0 : index
    %c0_17 = arith.constant 0 : index
    %36 = vector.load %arg6[%c0_16, %c0_17] : memref<8x1xf32, #tpu.memory_space<vmem>>, vector<8x1xf32>
    %37 = vector.broadcast %36 : vector<8x1xf32> to vector<8x128xf32>
    %38 = arith.addf %35, %37 : vector<8x128xf32>
    %cst_18 = arith.constant 0.000000e+00 : f32
    %39 = vector.broadcast %cst_18 : f32 to vector<8x128xf32>
    %40 = arith.maximumf %38, %39 : vector<8x128xf32>
    %c0_19 = arith.constant 0 : index
    %c0_20 = arith.constant 0 : index
    %41 = vector.load %arg7[%c0_19, %c0_20] : memref<8x4xf32, #tpu.memory_space<vmem>>, vector<8x4xf32>
    %cst_21 = arith.constant dense<0.000000e+00> : vector<8x128xf32>
    %42 = tpu.matmul %41, %14, %cst_21 {dimension_numbers = #tpu.dot_dimension_numbers<[1], [0], [0], [1], [0, 0, 1, 1], [], []>} : vector<8x4xf32>, vector<4x128xf32>, vector<8x128xf32> -> vector<8x128xf32>
    %c0_22 = arith.constant 0 : index
    %c0_23 = arith.constant 0 : index
    %43 = vector.load %arg8[%c0_22, %c0_23] : memref<8x1xf32, #tpu.memory_space<vmem>>, vector<8x1xf32>
    %44 = vector.broadcast %43 : vector<8x1xf32> to vector<8x128xf32>
    %45 = arith.addf %42, %44 : vector<8x128xf32>
    %46 = arith.addf %40, %45 : vector<8x128xf32>
    %cst_24 = arith.constant 0.000000e+00 : f32
    %47 = vector.broadcast %cst_24 : f32 to vector<8x128xf32>
    %48 = arith.maximumf %46, %47 : vector<8x128xf32>
    %c0_25 = arith.constant 0 : index
    %c0_26 = arith.constant 0 : index
    %c0_27 = arith.constant 0 : index
    %49 = vector.load %arg9[%c0_25, %c0_26, %c0_27] : memref<1x8x128xf32, #tpu.memory_space<vmem>>, vector<1x8x128xf32>
    %50 = vector.shape_cast %49 : vector<1x8x128xf32> to vector<8x128xf32>
    %51 = vector.shape_cast %48 : vector<8x128xf32> to vector<1x8x128xf32>
    tpu.vector_store %arg9[%c0_25, %c0_26, %c0_27], %51 {strides = array<i32>} : memref<1x8x128xf32, #tpu.memory_space<vmem>>, vector<1x8x128xf32>,
    %52 = vector.extract_strided_slice %16 {offsets = [0, 128], sizes = [4, 4], strides = [1, 1]} : vector<4x132xf32> to vector<4x4xf32>
    %c0_28 = arith.constant 0 : index
    %c0_29 = arith.constant 0 : index
    %53 = vector.load %arg10[%c0_28, %c0_29] : memref<4x4xf32, #tpu.memory_space<vmem>>, vector<4x4xf32>
    tpu.vector_store %arg10[%c0_28, %c0_29], %52 {strides = array<i32>} : memref<4x4xf32, #tpu.memory_space<vmem>>, vector<4x4xf32>,
    %54 = vector.extract_strided_slice %29 {offsets = [0, 128], sizes = [8, 4], strides = [1, 1]} : vector<8x132xf32> to vector<8x4xf32>
    %c0_30 = arith.constant 0 : index
    %c0_31 = arith.constant 0 : index
    %55 = vector.load %arg11[%c0_30, %c0_31] : memref<8x4xf32, #tpu.memory_space<vmem>>, vector<8x4xf32>
    tpu.vector_store %arg11[%c0_30, %c0_31], %54 {strides = array<i32>} : memref<8x4xf32, #tpu.memory_space<vmem>>, vector<8x4xf32>,
    return
  }
  func.func @transform_0(%arg0: i32, %arg1: i32) -> (i32, i32, i32) {
    %c0_i32 = arith.constant 0 : i32
    %c0_i32_0 = arith.constant 0 : i32
    return %arg0, %c0_i32, %arg1 : i32, i32, i32
  }
  func.func @transform_1(%arg0: i32, %arg1: i32) -> (i32, i32) {
    %c0_i32 = arith.constant 0 : i32
    %c0_i32_0 = arith.constant 0 : i32
    %c0_i32_1 = arith.constant 0 : i32
    return %c0_i32, %c0_i32_0 : i32, i32
  }
  func.func @transform_2(%arg0: i32, %arg1: i32) -> (i32, i32) {
    %c0_i32 = arith.constant 0 : i32
    %c0_i32_0 = arith.constant 0 : i32
    %c0_i32_1 = arith.constant 0 : i32
    return %c0_i32, %c0_i32_0 : i32, i32
  }
  func.func @transform_3(%arg0: i32, %arg1: i32) -> (i32, i32) {
    %c0_i32 = arith.constant 0 : i32
    %c0_i32_0 = arith.constant 0 : i32
    %c0_i32_1 = arith.constant 0 : i32
    return %c0_i32, %c0_i32_0 : i32, i32
  }
  func.func @transform_4(%arg0: i32, %arg1: i32) -> (i32, i32) {
    %c0_i32 = arith.constant 0 : i32
    %c0_i32_0 = arith.constant 0 : i32
    %c0_i32_1 = arith.constant 0 : i32
    return %c0_i32, %c0_i32_0 : i32, i32
  }
  func.func @transform_5(%arg0: i32, %arg1: i32) -> (i32, i32) {
    %c0_i32 = arith.constant 0 : i32
    %c0_i32_0 = arith.constant 0 : i32
    %c0_i32_1 = arith.constant 0 : i32
    return %c0_i32, %c0_i32_0 : i32, i32
  }
  func.func @transform_6(%arg0: i32, %arg1: i32) -> (i32, i32) {
    %c0_i32 = arith.constant 0 : i32
    %c0_i32_0 = arith.constant 0 : i32
    %c0_i32_1 = arith.constant 0 : i32
    return %c0_i32, %c0_i32_0 : i32, i32
  }
  func.func @transform_7(%arg0: i32, %arg1: i32) -> (i32, i32, i32) {
    %c0_i32 = arith.constant 0 : i32
    %c0_i32_0 = arith.constant 0 : i32
    return %arg0, %c0_i32, %arg1 : i32, i32, i32
  }
}

</mosaic_0001>

<bundles_post_ra>
// kernel: tpu_custom_call.1
= control target key start
LH: loop header
LB: loop body
LE: loop exit
PB: predicated region body
PF: predicated region fallthrough
CT: control target
= control target key end

     0   :  { %12 = vsyncpa [#allocation5], 0  ;;  %s905_s0 = inlined_call_operand.vmem [shape: f32[2,4,16], index: 0, kind: input, shape index: {}]   ;;  %s906_s1 = inlined_call_operand.vmem [shape: f32[8,12], index: 1, kind: input, shape index: {}]   ;;  %s907_s2 = inlined_call_operand.vmem [shape: f32[8,1], index: 2, kind: input, shape index: {}]   ;;  %s908_s3 = inlined_call_operand.vmem [shape: f32[8,24], index: 3, kind: input, shape index: {}]   ;;  %s909_s4 = inlined_call_operand.vmem [shape: f32[8,1], index: 4, kind: input, shape index: {}]   ;;  %s910_s5 = inlined_call_operand.vmem [shape: f32[8,4], index: 5, kind: input, shape index: {}]   ;;  %s911_s6 = inlined_call_operand.vmem [shape: f32[8,1], index: 6, kind: input, shape index: {}]   ;;  %s912_s7 = inlined_call_operand.hbm [shape: f32[2,8,16], index: 7, kind: output, shape index: {}]  }
   0x1   :  { %14 = vsyncpa [#allocation5 + $0x1], 0  ;;  %s771_s24 = smov 0   ;;  %s773_s25 = smov 0  }
   0x2   :  { %s775_s26 = smov 0   ;;  %s777_s27 = smov 0  }
   0x3   :  { %s779_s28 = smov 0   ;;  %s781_s29 = smov 0  }
   0x4 LB: > { %s553_s30 = sadd.s32 4294967295, %s724_s29   ;;  %s554_s8 = sadd.s32 4294967294, %s724_s29   ;;  %s724_s29 = sphi %s781_s29, %s20_s29   ;;  %s720_s28 = sphi %s779_s28, %s919_s28   ;;  %s716_s27 = sphi %s777_s27, %s918_s27   ;;  %s712_s26 = sphi %s775_s26, %s917_s26   ;;  %s708_s25 = sphi %s773_s25, %s916_s25   ;;  %s704_s24 = sphi %s771_s24, %s915_s24  }
   0x5   : > { %s32_s9 = sadd.s32 1, %s720_s28  ;;  %s195_s10 = sadd.s32 1, %s712_s26 }
   0x6   : > { %p34_p0 = scmp.ge.s32.totalorder %s32_s9, 2  ;;  %p205_p1 = scmp.ne.s32.totalorder %s712_s26, %s708_s25 }
   0x7   : > { %p206_p2 = scmp.eq.s32.totalorder %s553_s30, 1  ;;  %p211_p3 = scmp.ne.s32.totalorder %s708_s25, %s704_s24 }
   0x8   : > { %s921_s9 = smov (%p34_p0, %s32_s9), 0  ;;  %p212_p5 = scmp.eq.s32.totalorder %s554_s8, 1 }
   0x9   : > { %p811_p4 = por %p206_p2, %p205_p1  ;;  %s190_s12 = ssub.s32 %s720_s28, %s921_s9 }
   0xa   : > { %p557_p6 = scmp.ge.s32.totalorder %s724_s29, 1  ;;  %p193_p7 = scmp.eq.s32.totalorder %s190_s12, 0 }
   0xb   : > { %p818_p8 = por %p212_p5, %p211_p3  ;;  %p258_p9 = scmp.lt.s32.totalorder %s724_s29, 3 }
   0xc   : > { %s824_s14 = scalar_select %p193_p7, %s712_s26, %s195_s10  }
   0xd   : > { %p259_p10 = pnand %p557_p6, %p258_p9 }
   0xe   : > { %p292_p11 = scmp.lt.s32.totalorder (!%p259_p10), %s716_s27, 1  ;;  %s726_s20 = smov (!%p259_p10), 4  }
   0xf   : > { %262 = sbr.rel (%p259_p10) target bundleno = 753 (0x2f1), region = 48  ;;  %s728_s21 = smov (!%p259_p10), 124  }
  0x10   : > { %s729_s22 = smov (!%p259_p10), 126   ;;  %s566_s30 = sshll.u32 (!%p259_p10), %s716_s27, 3 }
  0x11   : > { %s477_s12 = scalar_lea.hbm (!%p259_p10), %s912_s7, %s566_s30  ;;  %s666_s30 = scalar_lea.hbm (!%p259_p10), %s912_s7, 16 }
  0x12   : > { %s481_s17 = sshll.u32 (!%p259_p10), %s477_s12, 4  ;;  %s482_s17 = int_to_ptr.hbm [resolvable:$true] %s481_s17 }
  0x14   : > { %v308_v0 = vlaneseq  ;;  %s293_s15 = scalar_select %p292_p11, %s716_s27, 1  ;;  %vm303_vm1 = vcmask 27648   ;;  %v727_v4 = vmov 0.0   ;;  %vm305_vm2 = vcmask 31744   ;;  %v343_v11 = vld [vmem:[%s907_s2] sm:$0xff] }
  0x15   : > { %304 = vst.msk [vmem:[#allocation2] sm:$0xf] %vm303_vm1, %v727_v4  ;;  %vm340_vm3 = vcmask 1043456   ;;  %v730_v12 = vmov 0   ;;  %vm338_vm4 = vcmask 1014784   ;;  %vm331_vm5 = vcmask 1031168  }
  0x16   : > { %v309_v1 = vand.u32 127, %v308_v0  ;;  %s559_s16 = sshll.u32 %s293_s15, 2  ;;  %306 = vst.msk [vmem:[#allocation3] sm:$0xff] %vm305_vm2, %v727_v4  ;;  %634 = vset.pattern.permute.xlu2 %v730_v12  ;;  %645 = vset.pattern.permute.xlu0 %v730_v12  ;;  %v342_v20 = vld [vmem:[%s906_s1] sm:$0xff]  ;;  %vm349_vm6 = vcmask 97280   ;;  %vm402_vm7 = vcmask 195584  }
  0x17   : > { %s298_s19 = scalar_lea.vmem %s905_s0, %s559_s16  ;;  %346 = vperm.xlu2 %634, %v343_v11   ;;  %v396_v26 = vld [vmem:[%s909_s4] sm:$0xff]  ;;  %s660_s27 = sshra.s32 %s482_s17, 4  ;;  %s661_s27 = int_to_ptr.hbm [resolvable:$true] %s660_s27 }
  0x18   : > { %vm313_vm0 = vcmp.lt.s32.totalorder %v309_v1, 16  ;;  %v307_v2 = vld [vmem:[%s298_s19] sm:$0xf]  ;;  %s662_s19 = scalar_lea.hbm %s661_s27, 8  ;;  %p667_p1 = scmp.lt.s32.totalorder %s661_s27, %s912_s7 }
  0x19   : > { %v316_v3 = vsel %vm313_vm0, %v307_v2, 0.0  ;;  %v427_v31 = vld [vmem:[%s910_s5] sm:$0xff]  ;;  %p663_p12 = scmp.ne.s32.totalorder %s661_s27, %s662_s19  ;;  %p668_p2 = scmp.lt.s32.totalorder %s666_s30, %s662_s19 }
  0x1a   : > { %319 = vrot.lane.b32.xlu0 %v316_v3, %s726_s20  ;;  %563 = vmatpush.msk.msra.mxu2 %vm340_vm3, %v316_v3  ;;  %v428_v32 = vld [vmem:[%s911_s6] sm:$0xff] }
  0x1b   : > { %564 = vmatmul.msk.f32.vlgmr.msra.gmra.mxu2 %vm305_vm2, %v427_v31  ;;  %v395_v41 = vld [vmem:[%s908_s3] sm:$0xff]  ;;  %p664_p13 = pnand %p663_p12, %p811_p4  ;;  %p669_p3 = por %p668_p2, %p667_p1 }
  0x1c   : > { %v317_v5 = vld [vmem:[#allocation2] sm:$0xf] }
  0x1d   : > { %v376_v27 = vld [vmem:[#allocation3] sm:$0xff]  ;;  %p665_p0 = pneg %p664_p13 }
  0x1f   : > { %p670_p5 = pnand %p669_p3, %p665_p0 }
  0x71   : > { %v347_v22 = vpop.permute.xlu2 %346 }
  0x8c   : > { %v320_v6 = vpop.permute.xlu0 %319 }
  0x8d   : > { %336 = vrot.lane.b32.xlu1 %v320_v6, %s728_s21  ;;  %v323_v7 = vsel %vm305_vm2, %v317_v5, %v320_v6  ;;  %463 = vst.msk [vmem:[#allocation2] sm:$0xf] %vm303_vm1, %v320_v6  ;;  %v326_v8 = vrot.slane %v320_v6, 4 }
  0x8e   : > { %334 = vrot.lane.b32.xlu0 %v323_v7, %s728_s21  ;;  %v325_v9 = vrot.slane %v323_v7, 4 }
  0x90   : > { %v629_v10 = vpack.i.bf16 %v326_v8, %v325_v9 }
  0x95   : > { %630 = vrot.lane.b32.xlu1 %v629_v10, %s729_s22 }
  0x9e   : > { %v456_v43 = vpop.f32.mrf.mxu2 }
  0xff   : > { %v337_v13 = vpop.permute.xlu1 %336 }
 0x100   : > { %v335_v14 = vpop.permute.xlu0 %334 }
 0x101   : > { %v339_v15 = vsel %vm338_vm4, %v335_v14, %v337_v13 }
 0x102   : > { %560 = vmatpush.msk.msra.mxu0 %vm340_vm3, %v339_v15 }
 0x107   : > { %v631_v16 = vpop.permute.xlu1 %630 }
 0x108   : > { %v633_v17 = vunpack.i.h.bf16 %v631_v16  ;;  %v632_v18 = vunpack.i.l.bf16 %v631_v16 }
 0x10a   : > { %v332_v19 = vsel %vm331_vm5, %v632_v18, %v633_v17 }
 0x10b   : > { %v341_v21 = vsel %vm340_vm3, %v323_v7, %v332_v19 }
 0x10c   : > { %370 = vmatpush.msra.mxu0 %v341_v21 }
 0x10d   : > { %561 = vmatmul.msk.f32.vlgmr.msra.gmra.mxu0 %vm349_vm6, %v342_v20 }
 0x18a   : > { %v372_v23 = vpop.f32.mrf.mxu0 }
 0x18b   : > { %v373_v24 = vadd.f32 %v372_v23, %v347_v22 }
 0x18d   : > { %v375_v25 = vmax.f32 %v373_v24, 0.0 }
 0x18f   : > { %378 = vrot.lane.b32.xlu2 %v375_v25, %s726_s20 }
 0x197   : > { %399 = vperm.xlu2 %634, %v396_v26  }
 0x1e9   : > { %v379_v28 = vpop.permute.xlu2 %378 }
 0x1ea   : > { %v381_v29 = vsel %vm305_vm2, %v376_v27, %v379_v28  ;;  %464 = vst.msk [vmem:[#allocation3] sm:$0xff] %vm305_vm2, %v379_v28 }
 0x1eb   : > { %v640_v30 = vpack.i.bf16 %v379_v28, %v381_v29 }
 0x1ed   : > { %641 = vrot.lane.b32.xlu1 %v640_v30, %s729_s22  ;;  %636 = vrot.lane.b32.xlu0 %v640_v30, %s728_s21  ;;  %s289_s22 = sand.u32 1, %s708_s25  }
 0x1ee   : > { %s558_s23 = sshll.u32 %s289_s22, 3  ;;  %s466_s18 = scalar_lea.sflag [#allocation5], %s289_s22 }
 0x1ef   : > { %s291_s15 = scalar_lea.vmem [#allocation4], %s558_s23 }
 0x1f0   : > { %s479_s16 = sshll.u32 %s291_s15, 4  ;;  %s480_s16 = int_to_ptr.vmem [resolvable:$true] %s479_s16 }
 0x1f1   : > { %v400_v44 = vpop.permute.xlu2 %399 }
 0x1f5   : > { %431 = vperm.xlu0 %645, %v428_v32  }
 0x25f   : > { %v642_v33 = vpop.permute.xlu1 %641  ;;  %v637_v34 = vpop.permute.xlu0 %636 }
 0x260   : > { %v644_v35 = vunpack.i.h.bf16 %v642_v33  ;;  %v643_v36 = vunpack.i.l.bf16 %v642_v33  ;;  %v639_v37 = vunpack.i.h.bf16 %v637_v34  ;;  %v638_v38 = vunpack.i.l.bf16 %v637_v34 }
 0x262   : > { %v393_v39 = vsel %vm338_vm4, %v638_v38, %v639_v37  ;;  %v387_v40 = vsel %vm331_vm5, %v643_v36, %v644_v35 }
 0x263   : > { %419 = vmatpush.msra.mxu1 %v393_v39 }
 0x265   : > { %420 = vmatpush.msra.mxu1 %v387_v40 }
 0x267   : > { %421 = vmatpush.msra.mxu1 %v381_v29  ;;  %v432_v42 = vpop.permute.xlu0 %431 }
 0x268   : > { %562 = vmatmul.msk.f32.vlgmr.msra.gmra.mxu1 %vm402_vm7, %v395_v41  ;;  %v457_v47 = vadd.f32 %v456_v43, %v432_v42 }
 0x2e5   : > { %v423_v45 = vpop.f32.mrf.mxu1 }
 0x2e6   : > { %v424_v46 = vadd.f32 %v423_v45, %v400_v44 }
 0x2e8   : > { %v426_v48 = vmax.f32 %v424_v46, 0.0 }
 0x2ea   : > { %v459_v49 = vadd.f32 %v457_v47, %v426_v48 }
 0x2ec   : > { %v460_v50 = vmax.f32 %v459_v49, 0.0 }
 0x2ee   : > { %461 = vst [vmem:[%s291_s15] sm:$0xff] %v460_v50 }
 0x2ef   : > { %673 = shalt.err (!%p670_p5)
}
 0x2f0   : > { %569 = dma.vmem_to_hbm [thread:$0]  (%p811_p4), %s480_s16, 128, %s482_s17, %s466_s18  }
 0x2f1 PF: > { %p575_p6 = scmp.ge.s32.totalorder %s724_s29, 2  ;;  %s493_s22 = sand.u32 1, %s704_s24  }
 0x2f2   : > { %s494_s10 = scalar_lea.sflag [#allocation5], %s493_s22 }
 0x2f3   : > { %p572_p7 = pnand %p575_p6, %p818_p8 }
 0x2f5   : > { %p573_p9 = pneg %p572_p7 }
 0x2f7   : > { %699 = dma.done.wait (%p573_p9), %s494_s10, 128  }
 0x2f8   : > { %701 = vsyncadd (%p573_p9), %s494_s10, 4294967168  ;;  %s20_s29 = sadd.s32 1, %s724_s29   ;;  %s915_s24 = smov %s708_s25 }
 0x2f9   : > { %p17_p10 = scmp.ge.s32.totalorder %s20_s29, 4   ;;  %s916_s25 = smov %s712_s26 }
 0x2fa   : > { %s917_s26 = smov %s824_s14  ;;  %s918_s27 = smov %s720_s28 }
 0x2fb   : > { %s919_s28 = smov %s921_s9  ;;  %19 = sbr.rel (!%p17_p10) target bundleno = 4 (0x4), region = 87 }
 0x300   :  { %500 = vsyncpa [#allocation5], 1 }
 0x301   :  { %502 = vsyncpa [#allocation5 + $0x1], 1 }

</bundles_post_ra>
